<compile_context>
chip_gen: v6e
topology: v6e:2x2x1
jax: 0.10.0
libtpu: 0.0.40
codegen_flags: <defaults>
</compile_context>

<pallas_src>
import jax
import jax.numpy as jnp
from jax.experimental import pallas as pl
from jax.experimental.pallas import tpu as pltpu


def bilinear_kernel(x_ref, w1_ref, b1_ref, w2_ref, b2_ref, sel_ref, out_ref):
    f32 = jnp.float32
    FO = sel_ref.shape[0]

    # Fused trunk layer 1: [obs | deltas] @ blockdiag(w1o, w1d) + [b1o | b1d]
    h = jnp.dot(x_ref[...], w1_ref[...], preferred_element_type=f32) + b1_ref[...]
    h = jnp.maximum(h, 0.0)

    # Fused trunk layer 2 -> [e_obs | e_delta_perm] (delta lanes already o*F+f order)
    e = jnp.dot(h.astype(w2_ref.dtype), w2_ref[...],
                preferred_element_type=f32) + b2_ref[...]

    prod = e[:, :FO] * e[:, FO:]                            # (tb, FO), f32

    # Segment-sum over f for every o: sel[j, o] = 1 iff j // F == o.
    out_ref[...] = jnp.dot(prod, sel_ref[...],
                           preferred_element_type=f32).astype(out_ref.dtype)


def _round_up(x, m):
    return ((x + m - 1) // m) * m


def bilinear_predictor(obs, deltas, params, *, output_dim, feature_dim,
                       tb=128, compute_dtype=jnp.bfloat16):
    """Fused BilinearPredictor forward. Returns (B, output_dim) float32."""
    B, D = obs.shape
    H = params["w1o"].shape[1]
    O, F = output_dim, feature_dim
    FO = F * O
    f32 = jnp.float32

    # ---- host-side parameter prep (cache / jit this in real use) ----
    # Column permutation folding the former FO x FO permutation matmul into w2d:
    # dest lane j = o*F + f  <-  src lane f*O + o.
    j = jnp.arange(FO)
    src = (j % F) * O + (j // F)
    w2d_perm = params["w2d"][:, src]
    b2d_perm = params["b2d"][:, src]

    # Block-diagonal fusion of the two trunks.
    w1 = jnp.zeros((2 * D, 2 * H), f32)
    w1 = w1.at[:D, :H].set(params["w1o"]).at[D:, H:].set(params["w1d"])
    b1 = jnp.concatenate([params["b1o"], params["b1d"]], axis=1)           # (1, 2H)
    w2 = jnp.zeros((2 * H, 2 * FO), f32)
    w2 = w2.at[:H, :FO].set(params["w2o"]).at[H:, FO:].set(w2d_perm)
    b2 = jnp.concatenate([params["b2o"], b2d_perm], axis=1)                # (1, 2FO)

    # 0/1 selection matrix for the per-output segment sum over f.
    sel = (j[:, None] // F == jnp.arange(O)[None, :]).astype(f32)          # (FO, O)

    # MXU operands in compute_dtype (bf16 by default); biases / sel stay f32.
    x_cat = jnp.concatenate([obs, deltas], axis=1).astype(compute_dtype)   # (B, 2D)
    w1 = w1.astype(compute_dtype)
    w2 = w2.astype(compute_dtype)

    # ---- batch tiling ----
    sub = 16 if jnp.dtype(compute_dtype).itemsize == 2 else 8   # sublane packing
    if B <= sub:
        tb_eff = B                                   # single full-extent block
    else:
        # Cap the tile near B/2 so the parallel grid has >=2 steps (both v7x
        # TensorCores get work); keep it sublane-aligned, at most `tb`.
        tb_eff = max(sub, min(tb, _round_up(pl.cdiv(B, 2), sub)))
    grid = (pl.cdiv(B, tb_eff),)

    def fixed(shape):
        # Grid-invariant blocks (weights/biases/sel).  pl.Buffered(1) would halve
        # their resident VMEM, but total weight VMEM is ~150 KiB here, so the
        # default double-buffering is kept for safety.
        return pl.BlockSpec(shape, lambda i: (0, 0))

    out = pl.pallas_call(
        bilinear_kernel,
        out_shape=jax.ShapeDtypeStruct((B, O), f32),
        grid_spec=pltpu.PrefetchScalarGridSpec(
            num_scalar_prefetch=0,
            grid=grid,
            in_specs=[
                pl.BlockSpec((tb_eff, 2 * D), lambda i: (i, 0)),   # [obs | deltas]
                fixed((2 * D, 2 * H)),                             # blockdiag W1
                fixed((1, 2 * H)),                                 # [b1o | b1d]
                fixed((2 * H, 2 * FO)),                            # blockdiag W2
                fixed((1, 2 * FO)),                                # [b2o | b2d_perm]
                fixed((FO, O)),                                    # selection matrix
            ],
            out_specs=pl.BlockSpec((tb_eff, O), lambda i: (i, 0)),
        ),
        compiler_params=pltpu.CompilerParams(
            dimension_semantics=("parallel",),
            vmem_limit_bytes=32 * 1024 * 1024),
    )(x_cat, w1, b1, w2, b2, sel)
    return out


def reference(obs, deltas, params, *, output_dim, feature_dim):
    """Pure-JAX f32 reference mirroring the PyTorch forward."""
    e_o = jnp.maximum(obs @ params["w1o"] + params["b1o"], 0.0) \
        @ params["w2o"] + params["b2o"]
    e_d = jnp.maximum(deltas @ params["w1d"] + params["b1d"], 0.0) \
        @ params["w2d"] + params["b2d"]
    A = e_o.reshape(-1, output_dim, feature_dim)
    Bm = e_d.reshape(-1, feature_dim, output_dim)
    # diagonal(matmul(A, Bm), dim1=1, dim2=2)
    return jnp.einsum("bof,bfo->bo", A, Bm)


if __name__ == "__main__":
    # Small synthetic config consistent with the module's __init__ (hidden_depth=1).
    input_dim = 32
    hidden_dim = 64
    feature_dim = 16
    output_dim = 8
    FO = feature_dim * output_dim

    key = jax.random.PRNGKey(0)
    keys = jax.random.split(key, 12)
    scale1 = 1.0 / jnp.sqrt(input_dim)
    scale2 = 1.0 / jnp.sqrt(hidden_dim)
    params = {
        "w1o": jax.random.normal(keys[0], (input_dim, hidden_dim), jnp.float32) * scale1,
        "b1o": jax.random.normal(keys[1], (1, hidden_dim), jnp.float32) * 0.01,
        "w2o": jax.random.normal(keys[2], (hidden_dim, FO), jnp.float32) * scale2,
        "b2o": jax.random.normal(keys[3], (1, FO), jnp.float32) * 0.01,
        "w1d": jax.random.normal(keys[4], (input_dim, hidden_dim), jnp.float32) * scale1,
        "b1d": jax.random.normal(keys[5], (1, hidden_dim), jnp.float32) * 0.01,
        "w2d": jax.random.normal(keys[6], (hidden_dim, FO), jnp.float32) * scale2,
        "b2d": jax.random.normal(keys[7], (1, FO), jnp.float32) * 0.01,
    }

    # --- Test 1: small batch, exact f32 compute path (semantics check) ---
    B1 = 8
    obs1 = jax.random.normal(keys[8], (B1, input_dim), jnp.float32)
    dlt1 = jax.random.normal(keys[9], (B1, input_dim), jnp.float32)
    pred1 = bilinear_predictor(obs1, dlt1, params,
                               output_dim=output_dim, feature_dim=feature_dim,
                               compute_dtype=jnp.float32)
    pred1 = jax.block_until_ready(pred1)
    ref1 = reference(obs1, dlt1, params,
                     output_dim=output_dim, feature_dim=feature_dim)
    assert pred1.shape == (B1, output_dim)
    assert jnp.allclose(pred1, ref1, rtol=1e-4, atol=1e-4), "f32 mismatch vs reference"

    # --- Test 2: multi-step grid with a partial last tile, bf16 MXU operands ---
    B2 = 40
    obs2 = jax.random.normal(keys[10], (B2, input_dim), jnp.float32)
    dlt2 = jax.random.normal(keys[11], (B2, input_dim), jnp.float32)
    pred2 = bilinear_predictor(obs2, dlt2, params,
                               output_dim=output_dim, feature_dim=feature_dim,
                               compute_dtype=jnp.bfloat16)
    pred2 = jax.block_until_ready(pred2)
    ref2 = reference(obs2, dlt2, params,
                     output_dim=output_dim, feature_dim=feature_dim)
    assert pred2.shape == (B2, output_dim)
    assert jnp.allclose(pred2, ref2, rtol=5e-2, atol=5e-2), "bf16 mismatch vs reference"

    print("KERNEL_OK")
</pallas_src>

<mosaic_0001>
module attributes {stable_mosaic.version = 11 : i64} {
  func.func @bilinear_kernel(%arg0: i32, %arg1: memref<8x64xf32, #tpu.memory_space<vmem>>, %arg2: memref<64x128xf32, #tpu.memory_space<vmem>>, %arg3: memref<1x128xf32, #tpu.memory_space<vmem>>, %arg4: memref<128x256xf32, #tpu.memory_space<vmem>>, %arg5: memref<1x256xf32, #tpu.memory_space<vmem>>, %arg6: memref<128x8xf32, #tpu.memory_space<vmem>>, %arg7: memref<8x8xf32, #tpu.memory_space<vmem>>) attributes {dimension_semantics = [#tpu.dimension_semantics<parallel>], iteration_bounds = array<i64: 1>, scalar_prefetch = 0 : i64, scratch_operands = 0 : i64, tpu.core_type = #tpu.core_type<tc>, window_params = [{transform_indices = @transform_0, window_bounds = array<i64: 8, 64>}, {pipeline_mode = #tpu.pipeline_mode<synchronous>, transform_indices = @transform_1, window_bounds = array<i64: 64, 128>}, {pipeline_mode = #tpu.pipeline_mode<synchronous>, transform_indices = @transform_2, window_bounds = array<i64: 1, 128>}, {pipeline_mode = #tpu.pipeline_mode<synchronous>, transform_indices = @transform_3, window_bounds = array<i64: 128, 256>}, {pipeline_mode = #tpu.pipeline_mode<synchronous>, transform_indices = @transform_4, window_bounds = array<i64: 1, 256>}, {pipeline_mode = #tpu.pipeline_mode<synchronous>, transform_indices = @transform_5, window_bounds = array<i64: 128, 8>}, {transform_indices = @transform_6, window_bounds = array<i64: 8, 8>}]} {
    %c0 = arith.constant 0 : index
    %c0_0 = arith.constant 0 : index
    %0 = vector.load %arg1[%c0, %c0_0] : memref<8x64xf32, #tpu.memory_space<vmem>>, vector<8x64xf32>
    %c0_1 = arith.constant 0 : index
    %c0_2 = arith.constant 0 : index
    %1 = vector.load %arg2[%c0_1, %c0_2] : memref<64x128xf32, #tpu.memory_space<vmem>>, vector<64x128xf32>
    %cst = arith.constant dense<0.000000e+00> : vector<8x128xf32>
    %2 = tpu.matmul %0, %1, %cst {dimension_numbers = #tpu.dot_dimension_numbers<[1], [0], [0], [1], [0, 0, 1, 1], [], []>} : vector<8x64xf32>, vector<64x128xf32>, vector<8x128xf32> -> vector<8x128xf32>
    %c0_3 = arith.constant 0 : index
    %c0_4 = arith.constant 0 : index
    %3 = vector.load %arg3[%c0_3, %c0_4] : memref<1x128xf32, #tpu.memory_space<vmem>>, vector<1x128xf32>
    %4 = vector.broadcast %3 : vector<1x128xf32> to vector<8x128xf32>
    %5 = arith.addf %2, %4 : vector<8x128xf32>
    %cst_5 = arith.constant 0.000000e+00 : f32
    %6 = vector.broadcast %cst_5 : f32 to vector<8x128xf32>
    %7 = arith.maximumf %5, %6 : vector<8x128xf32>
    %c0_6 = arith.constant 0 : index
    %c0_7 = arith.constant 0 : index
    %8 = vector.load %arg4[%c0_6, %c0_7] : memref<128x256xf32, #tpu.memory_space<vmem>>, vector<128x256xf32>
    %cst_8 = arith.constant dense<0.000000e+00> : vector<8x256xf32>
    %9 = tpu.matmul %7, %8, %cst_8 {dimension_numbers = #tpu.dot_dimension_numbers<[1], [0], [0], [1], [0, 0, 1, 1], [], []>} : vector<8x128xf32>, vector<128x256xf32>, vector<8x256xf32> -> vector<8x256xf32>
    %c0_9 = arith.constant 0 : index
    %c0_10 = arith.constant 0 : index
    %10 = vector.load %arg5[%c0_9, %c0_10] : memref<1x256xf32, #tpu.memory_space<vmem>>, vector<1x256xf32>
    %11 = vector.broadcast %10 : vector<1x256xf32> to vector<8x256xf32>
    %12 = arith.addf %9, %11 : vector<8x256xf32>
    %13 = vector.extract_strided_slice %12 {offsets = [0, 0], sizes = [8, 128], strides = [1, 1]} : vector<8x256xf32> to vector<8x128xf32>
    %14 = vector.extract_strided_slice %12 {offsets = [0, 128], sizes = [8, 128], strides = [1, 1]} : vector<8x256xf32> to vector<8x128xf32>
    %15 = arith.mulf %13, %14 : vector<8x128xf32>
    %c0_11 = arith.constant 0 : index
    %c0_12 = arith.constant 0 : index
    %16 = vector.load %arg6[%c0_11, %c0_12] : memref<128x8xf32, #tpu.memory_space<vmem>>, vector<128x8xf32>
    %cst_13 = arith.constant dense<0.000000e+00> : vector<8x8xf32>
    %17 = tpu.matmul %15, %16, %cst_13 {dimension_numbers = #tpu.dot_dimension_numbers<[1], [0], [0], [1], [0, 0, 1, 1], [], []>} : vector<8x128xf32>, vector<128x8xf32>, vector<8x8xf32> -> vector<8x8xf32>
    %c0_14 = arith.constant 0 : index
    %c0_15 = arith.constant 0 : index
    %18 = vector.load %arg7[%c0_14, %c0_15] : memref<8x8xf32, #tpu.memory_space<vmem>>, vector<8x8xf32>
    tpu.vector_store %arg7[%c0_14, %c0_15], %17 {strides = array<i32>} : memref<8x8xf32, #tpu.memory_space<vmem>>, vector<8x8xf32>,
    return
  }
  func.func @transform_0(%arg0: i32) -> (i32, i32) {
    %c0_i32 = arith.constant 0 : i32
    %c0_i32_0 = arith.constant 0 : i32
    return %arg0, %c0_i32 : i32, i32
  }
  func.func @transform_1(%arg0: i32) -> (i32, i32) {
    %c0_i32 = arith.constant 0 : i32
    %c0_i32_0 = arith.constant 0 : i32
    %c0_i32_1 = arith.constant 0 : i32
    return %c0_i32, %c0_i32_0 : i32, i32
  }
  func.func @transform_2(%arg0: i32) -> (i32, i32) {
    %c0_i32 = arith.constant 0 : i32
    %c0_i32_0 = arith.constant 0 : i32
    %c0_i32_1 = arith.constant 0 : i32
    return %c0_i32, %c0_i32_0 : i32, i32
  }
  func.func @transform_3(%arg0: i32) -> (i32, i32) {
    %c0_i32 = arith.constant 0 : i32
    %c0_i32_0 = arith.constant 0 : i32
    %c0_i32_1 = arith.constant 0 : i32
    return %c0_i32, %c0_i32_0 : i32, i32
  }
  func.func @transform_4(%arg0: i32) -> (i32, i32) {
    %c0_i32 = arith.constant 0 : i32
    %c0_i32_0 = arith.constant 0 : i32
    %c0_i32_1 = arith.constant 0 : i32
    return %c0_i32, %c0_i32_0 : i32, i32
  }
  func.func @transform_5(%arg0: i32) -> (i32, i32) {
    %c0_i32 = arith.constant 0 : i32
    %c0_i32_0 = arith.constant 0 : i32
    %c0_i32_1 = arith.constant 0 : i32
    return %c0_i32, %c0_i32_0 : i32, i32
  }
  func.func @transform_6(%arg0: i32) -> (i32, i32) {
    %c0_i32 = arith.constant 0 : i32
    %c0_i32_0 = arith.constant 0 : i32
    return %arg0, %c0_i32 : i32, i32
  }
}

</mosaic_0001>

<bundles_post_ra>
// kernel: tpu_custom_call.1
= control target key start
LH: loop header
LB: loop body
LE: loop exit
PB: predicated region body
PF: predicated region fallthrough
CT: control target
= control target key end

     0   :  { %11 = vsyncpa [#allocation3], 0  ;;  %s637_s0 = inlined_call_operand.vmem [shape: f32[8,64], index: 0, kind: input, shape index: {}]   ;;  %s638_s1 = inlined_call_operand.vmem [shape: f32[64,128], index: 1, kind: input, shape index: {}]   ;;  %s639_s2 = inlined_call_operand.vmem [shape: f32[1,128], index: 2, kind: input, shape index: {}]   ;;  %s640_s3 = inlined_call_operand.hbm [shape: f32[128,256], index: 3, kind: input, shape index: {}]   ;;  %s641_s4 = inlined_call_operand.vmem [shape: f32[1,256], index: 4, kind: input, shape index: {}]   ;;  %s642_s5 = inlined_call_operand.vmem [shape: f32[128,8], index: 5, kind: input, shape index: {}]   ;;  %s643_s6 = inlined_call_operand.hbm [shape: f32[8,8], index: 6, kind: output, shape index: {}]  }
   0x1   :  { %12 = vsyncpa [#allocation4], 0  ;;  %s480_s21 = smov [#allocation2]  }
   0x2   :  { %s24_s22 = sshll.u32 %s480_s21, 4  ;;  %s25_s22 = int_to_ptr.vmem [resolvable:$true] %s24_s22 }
   0x3   :  { %s444_s23 = scalar_lea.vmem %s25_s22, 4096  ;;  %p449_p1 = scmp.lt.s32.totalorder %s25_s22, %s25_s22 }
   0x4   :  { %p445_p0 = scmp.ne.s32.totalorder %s25_s22, %s444_s23  ;;  %p450_p2 = scmp.lt.s32.totalorder %s444_s23, %s444_s23 }
   0x6   :  { %p451_p3 = por %p450_p2, %p449_p1 }
   0x8   :  { %p452_p4 = pnand %p451_p3, %p445_p0 }
   0xa   :  { %455 = shalt.err (!%p452_p4)
}
   0xb   :  { %s481_s24 = smov 256   ;;  %s482_s25 = smov 16  }
   0xc   :  { %30 = dma.hbm_to_vmem [thread:$0]  %s640_s3, 4096, %s25_s22, [#allocation3], %s481_s24, %s481_s24, %s482_s25  }
   0xd   :  { %476 = dma.done.wait [#allocation3], 4096  }
   0xe   :  { %477 = vsyncadd [#allocation3], 4294963200  ;;  %v483_v0 = vmov 0.0   ;;  %vm484_vm0 = vmmov 0   ;;  %v46_v1 = vld [vmem:[%s638_s1 + $0x38] sm:$0xff]  ;;  %v45_v2 = vld [vmem:[%s638_s1 + $0x30] sm:$0xff]  ;;  %v163_v63 = vlaneseq }
   0xf   :  { %376 = vmatprep.subr.mxu0 %v483_v0  ;;  %392 = vmatprep.mubr.msk.f32.mxu0 %vm484_vm0, %v483_v0  ;;  %v44_v3 = vld [vmem:[%s638_s1 + $0x28] sm:$0xff]  ;;  %v160_v4 = vld [vmem:[#allocation2 + $0xf8] sm:$0xff]  ;;  %v159_v5 = vld [vmem:[#allocation2 + $0xf0] sm:$0xff]  ;;  %vm54_vm1 = vcmask 523264   ;;  %s485_s27 = smov [#allocation5]   ;;  %vm331_vm2 = vcmask 64512  }
  0x10   :  { %237 = vmatprep.mubr.f32.mxu1 %v483_v0  ;;  %377 = vmatpush3.msra.mxu0 %v46_v1  ;;  %v158_v6 = vld [vmem:[#allocation2 + $0xe8] sm:$0xff]  ;;  %v43_v7 = vld [vmem:[%s638_s1 + $0x20] sm:$0xff]  ;;  %v156_v9 = vld [vmem:[#allocation2 + $0xd8] sm:$0xff]  ;;  %v164_v1 = vshrl.u32 %v163_v63, 7  ;;  %s339_s28 = sshll.u32 %s485_s27, 4  ;;  %s340_s28 = int_to_ptr.vmem [resolvable:$true] %s339_s28 }
  0x11   :  { %378 = vmatprep.subr.mxu0 %v483_v0  ;;  %173 = vmatprep.subr.mxu1 %v160_v4  ;;  %v157_v8 = vld [vmem:[#allocation2 + $0xe0] sm:$0xff]  ;;  %v42_v10 = vld [vmem:[%s638_s1 + $0x18] sm:$0xff]  ;;  %v155_v11 = vld [vmem:[#allocation2 + $0xd0] sm:$0xff]  ;;  %p461_p6 = scmp.lt.s32.totalorder %s340_s28, %s340_s28 }
  0x12   :  { %379 = vmatpush3.msra.mxu0 %v45_v2  ;;  %174 = vmatpush1.msra.mxu1 %v159_v5  ;;  %v154_v12 = vld [vmem:[#allocation2 + $0xc8] sm:$0xff]  ;;  %v41_v13 = vld [vmem:[%s638_s1 + $0x10] sm:$0xff]  ;;  %v153_v14 = vld [vmem:[#allocation2 + $0xc0] sm:$0xff]  ;;  %v165_v2 = vsub.s32 0, %v164_v1 }
  0x13   :  { %380 = vmatprep.subr.mxu0 %v483_v0  ;;  %175 = vmatprep.subr.mxu1 %v158_v6  ;;  %v152_v15 = vld [vmem:[#allocation2 + $0xb8] sm:$0xff]  ;;  %v40_v16 = vld [vmem:[%s638_s1 + $0x8] sm:$0xff]  ;;  %v151_v17 = vld [vmem:[#allocation2 + $0xb0] sm:$0xff] }
  0x14   :  { %381 = vmatpush3.msra.mxu0 %v44_v3  ;;  %176 = vmatpush1.msra.mxu1 %v157_v8  ;;  %v150_v18 = vld [vmem:[#allocation2 + $0xa8] sm:$0xff]  ;;  %v39_v19 = vld [vmem:[%s638_s1] sm:$0xff]  ;;  %v148_v22 = vld [vmem:[#allocation2 + $0x98] sm:$0xff]  ;;  %v169_v3 = vsub.s32 1, %v164_v1 }
  0x15   :  { %382 = vmatprep.subr.mxu0 %v483_v0  ;;  %177 = vmatprep.subr.mxu1 %v156_v9  ;;  %v149_v20 = vld [vmem:[#allocation2 + $0xa0] sm:$0xff]  ;;  %v147_v23 = vld [vmem:[#allocation2 + $0x90] sm:$0xff]  ;;  %v146_v24 = vld [vmem:[#allocation2 + $0x88] sm:$0xff] }
  0x16   :  { %383 = vmatpush3.msra.mxu0 %v43_v7  ;;  %178 = vmatpush1.msra.mxu1 %v155_v11  ;;  %v38_v21 = vld [vmem:[%s637_s0] sm:$0xff]  ;;  %v144_v26 = vld [vmem:[#allocation2 + $0x78] sm:$0xff]  ;;  %v143_v27 = vld [vmem:[#allocation2 + $0x70] sm:$0xff] }
  0x17   :  { %384 = vmatprep.subr.mxu0 %v483_v0  ;;  %179 = vmatprep.subr.mxu1 %v154_v12  ;;  %v145_v25 = vld [vmem:[#allocation2 + $0x80] sm:$0xff]  ;;  %v142_v28 = vld [vmem:[#allocation2 + $0x68] sm:$0xff]  ;;  %v140_v30 = vld [vmem:[#allocation2 + $0x58] sm:$0xff] }
  0x18   :  { %385 = vmatpush3.msra.mxu0 %v42_v10  ;;  %180 = vmatpush1.msra.mxu1 %v153_v14  ;;  %v141_v29 = vld [vmem:[#allocation2 + $0x60] sm:$0xff]  ;;  %v139_v31 = vld [vmem:[#allocation2 + $0x50] sm:$0xff]  ;;  %v138_v32 = vld [vmem:[#allocation2 + $0x48] sm:$0xff] }
  0x19   :  { %386 = vmatprep.subr.mxu0 %v483_v0  ;;  %181 = vmatprep.subr.mxu1 %v152_v15  ;;  %v137_v33 = vld [vmem:[#allocation2 + $0x40] sm:$0xff]  ;;  %v136_v34 = vld [vmem:[#allocation2 + $0x38] sm:$0xff]  ;;  %v135_v35 = vld [vmem:[#allocation2 + $0x30] sm:$0xff] }
  0x1a   :  { %387 = vmatpush3.msra.mxu0 %v41_v13  ;;  %182 = vmatpush1.msra.mxu1 %v151_v17  ;;  %v134_v36 = vld [vmem:[#allocation2 + $0x28] sm:$0xff]  ;;  %v133_v37 = vld [vmem:[#allocation2 + $0x20] sm:$0xff]  ;;  %v132_v38 = vld [vmem:[#allocation2 + $0x18] sm:$0xff] }
  0x1b   :  { %388 = vmatprep.subr.mxu0 %v483_v0  ;;  %183 = vmatprep.subr.mxu1 %v150_v18  ;;  %v131_v39 = vld [vmem:[#allocation2 + $0x10] sm:$0xff]  ;;  %v130_v40 = vld [vmem:[#allocation2 + $0x8] sm:$0xff]  ;;  %v129_v41 = vld [vmem:[#allocation2] sm:$0xff] }
  0x1c   :  { %389 = vmatpush3.msra.mxu0 %v40_v16  ;;  %184 = vmatpush1.msra.mxu1 %v149_v20  ;;  %v260_v42 = vld [vmem:[%s642_s5 + $0x78] sm:$0xff]  ;;  %v259_v43 = vld [vmem:[%s642_s5 + $0x70] sm:$0xff]  ;;  %v258_v44 = vld [vmem:[%s642_s5 + $0x68] sm:$0xff] }
  0x1d   :  { %390 = vmatprep.subr.mxu0 %v483_v0  ;;  %185 = vmatprep.subr.mxu1 %v148_v22  ;;  %v257_v45 = vld [vmem:[%s642_s5 + $0x60] sm:$0xff]  ;;  %v256_v46 = vld [vmem:[%s642_s5 + $0x58] sm:$0xff]  ;;  %v255_v47 = vld [vmem:[%s642_s5 + $0x50] sm:$0xff] }
  0x1e   :  { %391 = vmatpush3.msra.mxu0 %v39_v19  ;;  %186 = vmatpush1.msra.mxu1 %v147_v23  ;;  %v254_v48 = vld [vmem:[%s642_s5 + $0x48] sm:$0xff]  ;;  %v253_v49 = vld [vmem:[%s642_s5 + $0x40] sm:$0xff]  ;;  %v252_v50 = vld [vmem:[%s642_s5 + $0x38] sm:$0xff] }
  0x1f   :  { %393 = vmatmul.mubr.msk.f32.vlgmr.msra.gmra.mxu0 %vm54_vm1, %v38_v21  ;;  %395 = vmatprep.subr.mxu0 %v483_v0  ;;  %v251_v51 = vld [vmem:[%s642_s5 + $0x30] sm:$0xff]  ;;  %v250_v52 = vld [vmem:[%s642_s5 + $0x28] sm:$0xff]  ;;  %v249_v53 = vld [vmem:[%s642_s5 + $0x20] sm:$0xff] }
  0x20   :  { %187 = vmatprep.subr.mxu1 %v146_v24  ;;  %427 = vmatprep.mubr.msk.f32.mxu0 %vm484_vm0, %v483_v0  ;;  %v348_v54 = vld [vmem:[%s639_s2] ss:$0 sm:$0xff]  ;;  %v248_v59 = vld [vmem:[%s642_s5 + $0x18] sm:$0xff]  ;;  %v247_v60 = vld [vmem:[%s642_s5 + $0x10] sm:$0xff] }
  0x21   :  { %188 = vmatpush1.msra.mxu1 %v145_v25  ;;  %396 = vmatpush3.msra.mxu0 %v260_v42  ;;  %v246_v61 = vld [vmem:[%s642_s5 + $0x8] sm:$0xff]  ;;  %v245_v62 = vld [vmem:[%s642_s5] sm:$0xff]  ;;  %s456_s5 = scalar_lea.vmem %s340_s28, 128 }
  0x22   :  { %189 = vmatprep.subr.mxu1 %v144_v26  ;;  %397 = vmatprep.subr.mxu0 %v483_v0  ;;  %v161_v4 = vld [vmem:[%s641_s4] sm:$0x3]  ;;  %p457_p5 = scmp.ne.s32.totalorder %s340_s28, %s456_s5  ;;  %p462_p7 = scmp.lt.s32.totalorder %s456_s5, %s456_s5 }
  0x23   :  { %190 = vmatpush1.msra.mxu1 %v143_v27  ;;  %398 = vmatpush3.msra.mxu0 %v259_v43  ;;  %v166_v5 = vrot.slane %v161_v4, %v165_v2  ;;  %v170_v6 = vrot.slane %v161_v4, %v169_v3 }
  0x24   :  { %191 = vmatprep.subr.mxu1 %v142_v28  ;;  %399 = vmatprep.subr.mxu0 %v483_v0  ;;  %p463_p8 = por %p462_p7, %p461_p6 }
  0x25   :  { %192 = vmatpush1.msra.mxu1 %v141_v29  ;;  %400 = vmatpush3.msra.mxu0 %v258_v44 }
  0x26   :  { %193 = vmatprep.subr.mxu1 %v140_v30  ;;  %401 = vmatprep.subr.mxu0 %v483_v0  ;;  %p464_p9 = pnand %p463_p8, %p457_p5 }
  0x27   :  { %194 = vmatpush1.msra.mxu1 %v139_v31  ;;  %402 = vmatpush3.msra.mxu0 %v257_v45 }
  0x28   :  { %195 = vmatprep.subr.mxu1 %v138_v32  ;;  %403 = vmatprep.subr.mxu0 %v483_v0 }
  0x29   :  { %196 = vmatpush1.msra.mxu1 %v137_v33  ;;  %404 = vmatpush3.msra.mxu0 %v256_v46 }
  0x2a   :  { %197 = vmatprep.subr.mxu1 %v136_v34  ;;  %405 = vmatprep.subr.mxu0 %v483_v0 }
  0x2b   :  { %198 = vmatpush1.msra.mxu1 %v135_v35  ;;  %406 = vmatpush3.msra.mxu0 %v255_v47 }
  0x2c   :  { %199 = vmatprep.subr.mxu1 %v134_v36  ;;  %407 = vmatprep.subr.mxu0 %v483_v0 }
  0x2d   :  { %200 = vmatpush1.msra.mxu1 %v133_v37  ;;  %408 = vmatpush3.msra.mxu0 %v254_v48 }
  0x2e   :  { %201 = vmatprep.subr.mxu1 %v132_v38  ;;  %409 = vmatprep.subr.mxu0 %v483_v0 }
  0x2f   :  { %202 = vmatpush1.msra.mxu1 %v131_v39  ;;  %410 = vmatpush3.msra.mxu0 %v253_v49 }
  0x30   :  { %203 = vmatprep.subr.mxu1 %v130_v40  ;;  %411 = vmatprep.subr.mxu0 %v483_v0 }
  0x31   :  { %204 = vmatpush1.msra.mxu1 %v129_v41  ;;  %412 = vmatpush3.msra.mxu0 %v252_v50 }
  0x32   :  { %413 = vmatprep.subr.mxu0 %v483_v0 }
  0x33   :  { %414 = vmatpush3.msra.mxu0 %v251_v51 }
  0x34   :  { %415 = vmatprep.subr.mxu0 %v483_v0 }
  0x35   :  { %416 = vmatpush3.msra.mxu0 %v250_v52 }
  0x36   :  { %417 = vmatprep.subr.mxu0 %v483_v0 }
  0x37   :  { %418 = vmatpush3.msra.mxu0 %v249_v53 }
  0x38   :  { %419 = vmatprep.subr.mxu0 %v483_v0 }
  0x39   :  { %420 = vmatpush3.msra.mxu0 %v248_v59 }
  0x3a   :  { %421 = vmatprep.subr.mxu0 %v483_v0 }
  0x3b   :  { %422 = vmatpush3.msra.mxu0 %v247_v60 }
  0x3c   :  { %423 = vmatprep.subr.mxu0 %v483_v0 }
  0x3d   :  { %424 = vmatpush3.msra.mxu0 %v246_v61 }
  0x3e   :  { %425 = vmatprep.subr.mxu0 %v483_v0 }
  0x3f   :  { %426 = vmatpush3.msra.mxu0 %v245_v62 }
  0xdf   :  { %v124_v55 = vpop.f32.mrf.mxu0 }
  0xe0   :  { %v125_v56 = vadd.f32 %v348_v54, %v124_v55 }
  0xe1   :  { %v394_v57 = vpop.f32.mrf.mxu0 }
  0xe2   :  { %v128_v58 = vmax.f32 %v125_v56, 0.0 }
  0xe4   :  { %238 = vmatmul.mubr.f32.vlgmr.msra.gmra.mxu1 %v128_v58 }
 0x1a4   :  { %v239_v7 = vpop.f32.mrf.mxu1 }
 0x1a5   :  { %v240_v9 = vadd.f32 %v239_v7, %v166_v5 }
 0x1a6   :  { %v241_v8 = vpop.f32.mrf.mxu1 }
 0x1a7   :  { %v242_v10 = vadd.f32 %v241_v8, %v170_v6 }
 0x1a9   :  { %v244_v0 = vmul.f32 %v242_v10, %v240_v9 }
 0x1ab   :  { %428 = vmatmul.mubr.f32.vlgmr.msra.gmra.mxu0 %v244_v0 }
 0x26b   :  { %v327_v11 = vpop.f32.mrf.mxu0 }
 0x26c   :  { %332 = vst.msk [vmem:[#allocation5] sm:$0xff] %vm331_vm2, %v327_v11 }
 0x26d   :  { %v429_v12 = vpop.f32.mrf.mxu0 }
 0x26e   :  { %467 = shalt.err (!%p464_p9)
}
 0x26f   :  { %342 = dma.vmem_to_hbm [thread:$0]  %s340_s28, 128, %s643_s6, [#allocation4]  }
 0x270   :  { %478 = dma.done.wait [#allocation4], 128  }
 0x271   :  { %479 = vsyncadd [#allocation4], 4294967168 }
 0x272   :  { %346 = vsyncpa [#allocation3], 1 }
 0x273   :  { %347 = vsyncpa [#allocation4], 1 }

</bundles_post_ra>
